<compile_context>
chip_gen: v6e
topology: v6e:2x2x1
jax: 0.10.0
libtpu: 0.0.40
codegen_flags: <defaults>
</compile_context>

<pallas_src>
import numpy as np
import jax
import jax.numpy as jnp
from jax import lax
from jax.experimental import pallas as pl
from jax.experimental.pallas import tpu as pltpu


# ----------------------------------------------------------------------------
# helpers
# ----------------------------------------------------------------------------
def _round_up(x, m):
    return ((x + m - 1) // m) * m


def _next_pow2(x):
    p = 1
    while p < x:
        p *= 2
    return p


# ----------------------------------------------------------------------------
# fused kernel:  [embedded+padded input] -> conv+relu (xN layers) -> hidden,
#                plus per-graph masked-max readout, all in one grid step.
# ----------------------------------------------------------------------------
def _make_fused_kernel(n_layers, K, pad, Bt, Lp, max_len, M, margins, dims_p):
    """margins[i] = rows of tile-level zero margin on each side of layer i input;
    margins[-1] == 0 so the final hidden has exactly M = Bt*Lp rows."""

    def kernel(lens_ref, x_ref, *refs):
        hid_ref = refs[2 * n_layers]
        gf_ref = refs[2 * n_layers + 1]

        h = x_ref[...]                                    # (M + 2*margins[0], C0p) f32
        for i in range(n_layers):
            w_ref = refs[2 * i]                           # (K * C_in_p, C_out_p)
            b_ref = refs[2 * i + 1]                       # (1, C_out_p)
            m_in, m_out = margins[i], margins[i + 1]
            d = m_in - m_out - pad                        # >= 0 by construction
            R = M + 2 * m_out                             # output rows this layer

            # im2col: K shifted row views side-by-side in the lane dim -> ONE
            # MXU push with contraction K * C_in_p.
            taps = [h[d + k: d + k + R, :] for k in range(K)]
            im2col = taps[0] if K == 1 else jnp.concatenate(taps, axis=1)
            acc = jnp.dot(im2col, w_ref[...], preferred_element_type=jnp.float32)
            y = jnp.maximum(acc + b_ref[...], 0.0)        # bias + ReLU

            # Re-impose the packed per-graph layout for the next layer: zero the
            # conv halo rows, rows beyond max_len and the tile margin rows
            # (this *is* the conv zero-padding, done in-VMEM, no HBM pad).
            g_idx = lax.broadcasted_iota(jnp.int32, (R, dims_p[i + 1]), 0) - m_out
            r = jnp.bitwise_and(g_idx, Lp - 1)            # row within graph slot (Lp pow2)
            keep = ((g_idx >= 0) & (g_idx < M) &
                    (r >= pad) & (r < pad + max_len))
            h = jnp.where(keep, y, 0.0)

        hid_ref[...] = h                                  # margins[-1]==0 -> (M, Cout_p)

        # ---- fused masked-max readout (per graph, static unroll over Bt) ----
        base = pl.program_id(0) * Bt
        Cp = dims_p[-1]
        pos = lax.broadcasted_iota(jnp.int32, (Lp, Cp), 0)
        for j in range(Bt):
            ln = lens_ref[base + j]                       # SMEM scalar (prefetched)
            valid = (pos >= pad) & (pos < pad + ln)
            yj = h[j * Lp:(j + 1) * Lp, :]                # Lp % 8 == 0 -> aligned slice
            gf_ref[pl.ds(j, 1), :] = jnp.max(
                jnp.where(valid, yj, -jnp.inf), axis=0, keepdims=True)
            # NOTE: a zero-length graph yields -inf (matches the pure-JAX
            # reference); such rows are sliced off for padded dummy graphs.

    return kernel


# ----------------------------------------------------------------------------
# full forward (defaults: relu, no shortcut, no concat_hidden, readout='max')
# ----------------------------------------------------------------------------
def glycan_cnn_forward(glycoword_type, lengths, embedding, weights, biases,
                       padding_id, padding):
    lengths_np = np.asarray(lengths, dtype=np.int32)
    B = int(lengths_np.shape[0])
    total = int(glycoword_type.shape[0])
    max_len = int(lengths_np.max())
    n_layers = len(weights)
    K = int(weights[0].shape[0])
    pad = int(padding)
    assert K == 2 * pad + 1, "fused kernel assumes 'same' conv: kernel_size == 2*padding+1, stride=1"
    Cin = int(embedding.shape[1])
    dims = [Cin] + [int(w.shape[2]) for w in weights]
    dims_p = [_round_up(d, 128) for d in dims]            # lane-dense channel dims
    Cout, Cout_p = dims[-1], dims_p[-1]

    # --- tiling: pow-of-2 per-graph slot, Bt graphs per grid step (M ~ 256) ---
    Lp = max(8, _next_pow2(max_len + 2 * pad))
    Bt = max(1, 256 // Lp)
    if Bt >= B:
        Bt, n_tiles = B, 1
    else:
        Bt = max(8, (Bt // 8) * 8)
        n_tiles = -(-B // Bt)
    B_pad = Bt * n_tiles
    M = Bt * Lp
    q = _round_up(max(pad, 1), 4) if pad > 0 else 0       # keep every row count % 8 == 0
    margins = [q * (n_layers - i) for i in range(n_layers + 1)]
    E = margins[0]

    # --- embedding lookup + vectorized variadic_to_padded (fill = padding_id) ---
    offsets = np.concatenate([[0], np.cumsum(lengths_np)[:-1]]).astype(np.int32)
    pos = np.arange(max_len, dtype=np.int32)[None, :]
    valid = pos < lengths_np[:, None]                     # (B, max_len) host bool
    gidx = np.where(valid, offsets[:, None] + pos, 0)     # (B, max_len) gather idx
    emb = jnp.take(embedding, glycoword_type, axis=0)     # (total, Cin)
    padded = jnp.take(emb, jnp.asarray(gidx.reshape(-1)), axis=0).reshape(B, max_len, Cin)
    padded = jnp.where(jnp.asarray(valid)[..., None], padded, jnp.float32(padding_id))

    # --- lane-dense channel pad + per-graph halo slot + tile margins (input only) ---
    x = jnp.pad(padded, ((0, B_pad - B), (0, 0), (0, dims_p[0] - Cin)))
    x = jnp.pad(x, ((0, 0), (pad, Lp - pad - max_len), (0, 0)))   # (B_pad, Lp, C0p)
    x = x.reshape(n_tiles, M, dims_p[0])
    if E:
        x = jnp.pad(x, ((0, 0), (E, E), (0, 0)))
    x = x.reshape(n_tiles * (M + 2 * E), dims_p[0])

    # --- channel-padded, im2col-flattened weights / biases ---
    flat_wb = []
    for i, (w, b) in enumerate(zip(weights, biases)):
        wp = jnp.pad(w, ((0, 0), (0, dims_p[i] - dims[i]), (0, dims_p[i + 1] - dims[i + 1])))
        flat_wb.append(wp.reshape(K * dims_p[i], dims_p[i + 1]))
        flat_wb.append(jnp.pad(b, (0, dims_p[i + 1] - dims[i + 1])).reshape(1, dims_p[i + 1]))

    lens_pad = jnp.asarray(np.pad(lengths_np, (0, B_pad - B)), jnp.int32)

    kernel = _make_fused_kernel(n_layers, K, pad, Bt, Lp, max_len, M, margins, dims_p)

    in_specs = [pl.BlockSpec((M + 2 * E, dims_p[0]), lambda i, lens: (i, 0))]
    for li in range(n_layers):
        in_specs.append(pl.BlockSpec((K * dims_p[li], dims_p[li + 1]),
                                     lambda i, lens: (0, 0)))
        in_specs.append(pl.BlockSpec((1, dims_p[li + 1]),
                                     lambda i, lens: (0, 0)))

    hid_flat, gf = pl.pallas_call(
        kernel,
        out_shape=(jax.ShapeDtypeStruct((n_tiles * M, Cout_p), jnp.float32),
                   jax.ShapeDtypeStruct((B_pad, Cout_p), jnp.float32)),
        grid_spec=pltpu.PrefetchScalarGridSpec(
            num_scalar_prefetch=1,
            grid=(n_tiles,),
            in_specs=in_specs,
            out_specs=[pl.BlockSpec((M, Cout_p), lambda i, lens: (i, 0)),
                       pl.BlockSpec((Bt, Cout_p), lambda i, lens: (i, 0))],
        ),
        compiler_params=pltpu.CompilerParams(
            dimension_semantics=("parallel",)),
    )(lens_pad, x, *flat_wb)

    # --- epilogue: slice real graphs / rows / channels (tiny XLA ops) ---
    hid = hid_flat.reshape(B_pad, Lp, Cout_p)[:B, pad:pad + max_len, :Cout]
    graph_feature = gf[:B, :Cout]
    # vectorized padded_to_variadic: one gather
    graph_of = np.repeat(np.arange(B, dtype=np.int32), lengths_np)
    pos_in = (np.arange(total, dtype=np.int32) - offsets[graph_of]).astype(np.int32)
    glycoword_feature = hid[jnp.asarray(graph_of), jnp.asarray(pos_in), :]
    return {"graph_feature": graph_feature, "glycoword_feature": glycoword_feature}


# ----------------------------------------------------------------------------
# pure-JAX reference (unfused) for correctness checking
# ----------------------------------------------------------------------------
def reference_forward(glycoword_type, lengths, embedding, weights, biases,
                      padding_id, padding):
    lengths_np = np.asarray(lengths, dtype=np.int32)
    B = int(lengths_np.shape[0])
    max_len = int(lengths_np.max())
    Cin = int(embedding.shape[1])
    offsets = np.concatenate([[0], np.cumsum(lengths_np)[:-1]]).astype(np.int32)
    pos = np.arange(max_len, dtype=np.int32)[None, :]
    valid = pos < lengths_np[:, None]
    gidx = np.where(valid, offsets[:, None] + pos, 0)
    emb = jnp.take(embedding, glycoword_type, axis=0)
    h = jnp.take(emb, jnp.asarray(gidx.reshape(-1)), axis=0).reshape(B, max_len, Cin)
    h = jnp.where(jnp.asarray(valid)[..., None], h, jnp.float32(padding_id))
    for w, b in zip(weights, biases):
        x_ncl = jnp.transpose(h, (0, 2, 1))               # (B, Cin, L)
        w_oik = jnp.transpose(w, (2, 1, 0))               # (Cout, Cin, K)
        y = lax.conv_general_dilated(
            x_ncl, w_oik, window_strides=(1,), padding=[(padding, padding)],
            dimension_numbers=("NCH", "OIH", "NCH"))
        y = y + b[None, :, None]
        h = jax.nn.relu(jnp.transpose(y, (0, 2, 1)))
    mask = jnp.asarray(valid)[..., None]
    gf = jnp.max(jnp.where(mask, h, -jnp.inf), axis=1)
    parts = [h[b, :int(lengths_np[b])] for b in range(B)]
    return {"graph_feature": gf, "glycoword_feature": jnp.concatenate(parts, axis=0)}


# ----------------------------------------------------------------------------
# demo / self-test
# ----------------------------------------------------------------------------
if __name__ == "__main__":
    input_dim = 16
    hidden_dims = [32, 32]
    glycoword_dim = 12
    kernel_size, stride, padding = 3, 1, 1
    padding_id = input_dim - 1
    dims = [input_dim] + list(hidden_dims)

    key = jax.random.PRNGKey(0)
    keys = jax.random.split(key, 3 + 2 * (len(dims) - 1))
    embedding = jax.random.normal(keys[0], (glycoword_dim, input_dim), jnp.float32)
    weights, biases = [], []
    for i in range(len(dims) - 1):
        kw, kb = keys[1 + 2 * i], keys[2 + 2 * i]
        scale = 1.0 / np.sqrt(dims[i] * kernel_size)
        weights.append(scale * jax.random.normal(
            kw, (kernel_size, dims[i], dims[i + 1]), jnp.float32))
        biases.append(scale * jax.random.normal(kb, (dims[i + 1],), jnp.float32))

    def run_case(lengths, data_key):
        lengths = np.asarray(lengths, dtype=np.int32)
        total = int(lengths.sum())
        glycoword_type = jax.random.randint(data_key, (total,), 0, glycoword_dim)
        out = glycan_cnn_forward(glycoword_type, lengths, embedding, weights,
                                 biases, padding_id, padding)
        jax.block_until_ready(out)
        ref = reference_forward(glycoword_type, lengths, embedding, weights,
                                biases, padding_id, padding)
        np.testing.assert_allclose(np.asarray(out["graph_feature"]),
                                   np.asarray(ref["graph_feature"]),
                                   rtol=1e-4, atol=1e-4)
        np.testing.assert_allclose(np.asarray(out["glycoword_feature"]),
                                   np.asarray(ref["glycoword_feature"]),
                                   rtol=1e-4, atol=1e-4)

    # case 1: small batch, single tile (2 glycans, 6 and 8 glycowords)
    run_case([6, 8], keys[-1])

    # case 2: larger ragged batch -> multiple tiles, 16 graphs per grid step,
    # padded dummy graphs in the last tile.
    lengths2 = [5, 7, 3, 8, 6, 4, 9, 2, 7, 5, 6, 8, 3, 4, 7, 6, 5, 8, 2, 6]
    run_case(lengths2, jax.random.PRNGKey(1))

    print("KERNEL_OK")
</pallas_src>

<mosaic_0001>
module attributes {stable_mosaic.version = 11 : i64} {
  func.func @kernel(%arg0: i32, %arg1: memref<2xi32, #tpu.memory_space<smem>>, %arg2: memref<48x128xf32, #tpu.memory_space<vmem>>, %arg3: memref<384x128xf32, #tpu.memory_space<vmem>>, %arg4: memref<1x128xf32, #tpu.memory_space<vmem>>, %arg5: memref<384x128xf32, #tpu.memory_space<vmem>>, %arg6: memref<1x128xf32, #tpu.memory_space<vmem>>, %arg7: memref<32x128xf32, #tpu.memory_space<vmem>>, %arg8: memref<2x128xf32, #tpu.memory_space<vmem>>) attributes {dimension_semantics = [#tpu.dimension_semantics<parallel>], iteration_bounds = array<i64: 1>, scalar_prefetch = 1 : i64, scratch_operands = 0 : i64, tpu.core_type = #tpu.core_type<tc>, window_params = [{transform_indices = @transform_0, window_bounds = array<i64: 48, 128>}, {pipeline_mode = #tpu.pipeline_mode<synchronous>, transform_indices = @transform_1, window_bounds = array<i64: 384, 128>}, {pipeline_mode = #tpu.pipeline_mode<synchronous>, transform_indices = @transform_2, window_bounds = array<i64: 1, 128>}, {pipeline_mode = #tpu.pipeline_mode<synchronous>, transform_indices = @transform_3, window_bounds = array<i64: 384, 128>}, {pipeline_mode = #tpu.pipeline_mode<synchronous>, transform_indices = @transform_4, window_bounds = array<i64: 1, 128>}, {transform_indices = @transform_5, window_bounds = array<i64: 32, 128>}, {transform_indices = @transform_6, window_bounds = array<i64: 2, 128>}]} {
    %c0 = arith.constant 0 : index
    %c0_0 = arith.constant 0 : index
    %0 = vector.load %arg2[%c0, %c0_0] : memref<48x128xf32, #tpu.memory_space<vmem>>, vector<48x128xf32>
    %1 = vector.extract_strided_slice %0 {offsets = [3, 0], sizes = [40, 128], strides = [1, 1]} : vector<48x128xf32> to vector<40x128xf32>
    %2 = vector.extract_strided_slice %0 {offsets = [4, 0], sizes = [40, 128], strides = [1, 1]} : vector<48x128xf32> to vector<40x128xf32>
    %3 = vector.extract_strided_slice %0 {offsets = [5, 0], sizes = [40, 128], strides = [1, 1]} : vector<48x128xf32> to vector<40x128xf32>
    %4 = tpu.concatenate %1, %2, %3 in 1 : vector<40x128xf32>, vector<40x128xf32>, vector<40x128xf32> -> vector<40x384xf32>
    %c0_1 = arith.constant 0 : index
    %c0_2 = arith.constant 0 : index
    %5 = vector.load %arg3[%c0_1, %c0_2] : memref<384x128xf32, #tpu.memory_space<vmem>>, vector<384x128xf32>
    %cst = arith.constant dense<0.000000e+00> : vector<40x128xf32>
    %6 = tpu.matmul %4, %5, %cst {dimension_numbers = #tpu.dot_dimension_numbers<[1], [0], [0], [1], [0, 0, 1, 1], [], []>} : vector<40x384xf32>, vector<384x128xf32>, vector<40x128xf32> -> vector<40x128xf32>
    %c0_3 = arith.constant 0 : index
    %c0_4 = arith.constant 0 : index
    %7 = vector.load %arg4[%c0_3, %c0_4] : memref<1x128xf32, #tpu.memory_space<vmem>>, vector<1x128xf32>
    %8 = vector.broadcast %7 : vector<1x128xf32> to vector<40x128xf32>
    %9 = arith.addf %6, %8 : vector<40x128xf32>
    %cst_5 = arith.constant 0.000000e+00 : f32
    %10 = vector.broadcast %cst_5 : f32 to vector<40x128xf32>
    %11 = arith.maximumf %9, %10 : vector<40x128xf32>
    %12 = tpu.iota {dimensions = array<i32: 0>} : vector<40x128xi32>
    %c4_i32 = arith.constant 4 : i32
    %13 = vector.broadcast %c4_i32 : i32 to vector<40x128xi32>
    %14 = arith.subi %12, %13 : vector<40x128xi32>
    %c15_i32 = arith.constant 15 : i32
    %15 = vector.broadcast %c15_i32 : i32 to vector<40x128xi32>
    %16 = arith.andi %14, %15 : vector<40x128xi32>
    %c0_i32 = arith.constant 0 : i32
    %17 = vector.broadcast %c0_i32 : i32 to vector<40x128xi32>
    %18 = arith.cmpi sge, %14, %17 : vector<40x128xi32>
    %c32_i32 = arith.constant 32 : i32
    %19 = vector.broadcast %c32_i32 : i32 to vector<40x128xi32>
    %20 = arith.cmpi slt, %14, %19 : vector<40x128xi32>
    %21 = arith.andi %18, %20 : vector<40x128xi1>
    %c1_i32 = arith.constant 1 : i32
    %22 = vector.broadcast %c1_i32 : i32 to vector<40x128xi32>
    %23 = arith.cmpi sge, %16, %22 : vector<40x128xi32>
    %24 = arith.andi %21, %23 : vector<40x128xi1>
    %c9_i32 = arith.constant 9 : i32
    %25 = vector.broadcast %c9_i32 : i32 to vector<40x128xi32>
    %26 = arith.cmpi slt, %16, %25 : vector<40x128xi32>
    %27 = arith.andi %24, %26 : vector<40x128xi1>
    %cst_6 = arith.constant 0.000000e+00 : f32
    %28 = vector.broadcast %cst_6 : f32 to vector<40x128xf32>
    %29 = arith.select %27, %11, %28 : vector<40x128xi1>, vector<40x128xf32>
    %30 = vector.extract_strided_slice %29 {offsets = [3, 0], sizes = [32, 128], strides = [1, 1]} : vector<40x128xf32> to vector<32x128xf32>
    %31 = vector.extract_strided_slice %29 {offsets = [4, 0], sizes = [32, 128], strides = [1, 1]} : vector<40x128xf32> to vector<32x128xf32>
    %32 = vector.extract_strided_slice %29 {offsets = [5, 0], sizes = [32, 128], strides = [1, 1]} : vector<40x128xf32> to vector<32x128xf32>
    %33 = tpu.concatenate %30, %31, %32 in 1 : vector<32x128xf32>, vector<32x128xf32>, vector<32x128xf32> -> vector<32x384xf32>
    %c0_7 = arith.constant 0 : index
    %c0_8 = arith.constant 0 : index
    %34 = vector.load %arg5[%c0_7, %c0_8] : memref<384x128xf32, #tpu.memory_space<vmem>>, vector<384x128xf32>
    %cst_9 = arith.constant dense<0.000000e+00> : vector<32x128xf32>
    %35 = tpu.matmul %33, %34, %cst_9 {dimension_numbers = #tpu.dot_dimension_numbers<[1], [0], [0], [1], [0, 0, 1, 1], [], []>} : vector<32x384xf32>, vector<384x128xf32>, vector<32x128xf32> -> vector<32x128xf32>
    %c0_10 = arith.constant 0 : index
    %c0_11 = arith.constant 0 : index
    %36 = vector.load %arg6[%c0_10, %c0_11] : memref<1x128xf32, #tpu.memory_space<vmem>>, vector<1x128xf32>
    %37 = vector.broadcast %36 : vector<1x128xf32> to vector<32x128xf32>
    %38 = arith.addf %35, %37 : vector<32x128xf32>
    %cst_12 = arith.constant 0.000000e+00 : f32
    %39 = vector.broadcast %cst_12 : f32 to vector<32x128xf32>
    %40 = arith.maximumf %38, %39 : vector<32x128xf32>
    %41 = tpu.iota {dimensions = array<i32: 0>} : vector<32x128xi32>
    %c0_i32_13 = arith.constant 0 : i32
    %42 = vector.broadcast %c0_i32_13 : i32 to vector<32x128xi32>
    %43 = arith.subi %41, %42 : vector<32x128xi32>
    %c15_i32_14 = arith.constant 15 : i32
    %44 = vector.broadcast %c15_i32_14 : i32 to vector<32x128xi32>
    %45 = arith.andi %43, %44 : vector<32x128xi32>
    %c0_i32_15 = arith.constant 0 : i32
    %46 = vector.broadcast %c0_i32_15 : i32 to vector<32x128xi32>
    %47 = arith.cmpi sge, %43, %46 : vector<32x128xi32>
    %c32_i32_16 = arith.constant 32 : i32
    %48 = vector.broadcast %c32_i32_16 : i32 to vector<32x128xi32>
    %49 = arith.cmpi slt, %43, %48 : vector<32x128xi32>
    %50 = arith.andi %47, %49 : vector<32x128xi1>
    %c1_i32_17 = arith.constant 1 : i32
    %51 = vector.broadcast %c1_i32_17 : i32 to vector<32x128xi32>
    %52 = arith.cmpi sge, %45, %51 : vector<32x128xi32>
    %53 = arith.andi %50, %52 : vector<32x128xi1>
    %c9_i32_18 = arith.constant 9 : i32
    %54 = vector.broadcast %c9_i32_18 : i32 to vector<32x128xi32>
    %55 = arith.cmpi slt, %45, %54 : vector<32x128xi32>
    %56 = arith.andi %53, %55 : vector<32x128xi1>
    %cst_19 = arith.constant 0.000000e+00 : f32
    %57 = vector.broadcast %cst_19 : f32 to vector<32x128xf32>
    %58 = arith.select %56, %40, %57 : vector<32x128xi1>, vector<32x128xf32>
    %c0_20 = arith.constant 0 : index
    %c0_21 = arith.constant 0 : index
    %59 = vector.load %arg7[%c0_20, %c0_21] : memref<32x128xf32, #tpu.memory_space<vmem>>, vector<32x128xf32>
    tpu.vector_store %arg7[%c0_20, %c0_21], %58 {strides = array<i32>} : memref<32x128xf32, #tpu.memory_space<vmem>>, vector<32x128xf32>,
    %c2_i32 = arith.constant 2 : i32
    %60 = arith.muli %arg0, %c2_i32 : i32
    %61 = tpu.iota {dimensions = array<i32: 0>} : vector<16x128xi32>
    %c0_i32_22 = arith.constant 0 : i32
    %62 = arith.addi %60, %c0_i32_22 : i32
    %63 = arith.index_cast %62 : i32 to index
    %64 = memref.load %arg1[%63] : memref<2xi32, #tpu.memory_space<smem>>
    %c1_i32_23 = arith.constant 1 : i32
    %65 = vector.broadcast %c1_i32_23 : i32 to vector<16x128xi32>
    %66 = arith.cmpi sge, %61, %65 : vector<16x128xi32>
    %c1_i32_24 = arith.constant 1 : i32
    %67 = arith.addi %c1_i32_24, %64 : i32
    %68 = vector.broadcast %67 : i32 to vector<16x128xi32>
    %69 = arith.cmpi slt, %61, %68 : vector<16x128xi32>
    %70 = arith.andi %66, %69 : vector<16x128xi1>
    %71 = vector.extract_strided_slice %58 {offsets = [0, 0], sizes = [16, 128], strides = [1, 1]} : vector<32x128xf32> to vector<16x128xf32>
    %cst_25 = arith.constant 0xFF800000 : f32
    %72 = vector.broadcast %cst_25 : f32 to vector<16x128xf32>
    %73 = arith.select %70, %71, %72 : vector<16x128xi1>, vector<16x128xf32>
    %cst_26 = arith.constant dense<0xFF800000> : vector<128xf32>
    %74 = vector.multi_reduction <maximumf>, %73, %cst_26 [0] : vector<16x128xf32> to vector<128xf32>
    %75 = vector.shape_cast %74 : vector<128xf32> to vector<1x128xf32>
    %c0_27 = arith.constant 0 : index
    %c0_28 = arith.constant 0 : index
    %76 = vector.load %arg8[%c0_27, %c0_28] : memref<2x128xf32, #tpu.memory_space<vmem>>, vector<1x128xf32>
    tpu.vector_store %arg8[%c0_27, %c0_28], %75 {strides = array<i32>} : memref<2x128xf32, #tpu.memory_space<vmem>>, vector<1x128xf32>,
    %c1_i32_29 = arith.constant 1 : i32
    %77 = arith.addi %60, %c1_i32_29 : i32
    %78 = arith.index_cast %77 : i32 to index
    %79 = memref.load %arg1[%78] : memref<2xi32, #tpu.memory_space<smem>>
    %c1_i32_30 = arith.constant 1 : i32
    %80 = vector.broadcast %c1_i32_30 : i32 to vector<16x128xi32>
    %81 = arith.cmpi sge, %61, %80 : vector<16x128xi32>
    %c1_i32_31 = arith.constant 1 : i32
    %82 = arith.addi %c1_i32_31, %79 : i32
    %83 = vector.broadcast %82 : i32 to vector<16x128xi32>
    %84 = arith.cmpi slt, %61, %83 : vector<16x128xi32>
    %85 = arith.andi %81, %84 : vector<16x128xi1>
    %86 = vector.extract_strided_slice %58 {offsets = [16, 0], sizes = [16, 128], strides = [1, 1]} : vector<32x128xf32> to vector<16x128xf32>
    %cst_32 = arith.constant 0xFF800000 : f32
    %87 = vector.broadcast %cst_32 : f32 to vector<16x128xf32>
    %88 = arith.select %85, %86, %87 : vector<16x128xi1>, vector<16x128xf32>
    %cst_33 = arith.constant dense<0xFF800000> : vector<128xf32>
    %89 = vector.multi_reduction <maximumf>, %88, %cst_33 [0] : vector<16x128xf32> to vector<128xf32>
    %90 = vector.shape_cast %89 : vector<128xf32> to vector<1x128xf32>
    %c1 = arith.constant 1 : index
    %c0_34 = arith.constant 0 : index
    %91 = vector.load %arg8[%c1, %c0_34] : memref<2x128xf32, #tpu.memory_space<vmem>>, vector<1x128xf32>
    tpu.vector_store %arg8[%c1, %c0_34], %90 {strides = array<i32>} : memref<2x128xf32, #tpu.memory_space<vmem>>, vector<1x128xf32>,
    return
  }
  func.func @transform_0(%arg0: i32, %arg1: memref<2xi32, #tpu.memory_space<smem>>) -> (i32, i32) {
    %c0_i32 = arith.constant 0 : i32
    %c0_i32_0 = arith.constant 0 : i32
    return %arg0, %c0_i32 : i32, i32
  }
  func.func @transform_1(%arg0: i32, %arg1: memref<2xi32, #tpu.memory_space<smem>>) -> (i32, i32) {
    %c0_i32 = arith.constant 0 : i32
    %c0_i32_0 = arith.constant 0 : i32
    %c0_i32_1 = arith.constant 0 : i32
    return %c0_i32, %c0_i32_0 : i32, i32
  }
  func.func @transform_2(%arg0: i32, %arg1: memref<2xi32, #tpu.memory_space<smem>>) -> (i32, i32) {
    %c0_i32 = arith.constant 0 : i32
    %c0_i32_0 = arith.constant 0 : i32
    %c0_i32_1 = arith.constant 0 : i32
    return %c0_i32, %c0_i32_0 : i32, i32
  }
  func.func @transform_3(%arg0: i32, %arg1: memref<2xi32, #tpu.memory_space<smem>>) -> (i32, i32) {
    %c0_i32 = arith.constant 0 : i32
    %c0_i32_0 = arith.constant 0 : i32
    %c0_i32_1 = arith.constant 0 : i32
    return %c0_i32, %c0_i32_0 : i32, i32
  }
  func.func @transform_4(%arg0: i32, %arg1: memref<2xi32, #tpu.memory_space<smem>>) -> (i32, i32) {
    %c0_i32 = arith.constant 0 : i32
    %c0_i32_0 = arith.constant 0 : i32
    %c0_i32_1 = arith.constant 0 : i32
    return %c0_i32, %c0_i32_0 : i32, i32
  }
  func.func @transform_5(%arg0: i32, %arg1: memref<2xi32, #tpu.memory_space<smem>>) -> (i32, i32) {
    %c0_i32 = arith.constant 0 : i32
    %c0_i32_0 = arith.constant 0 : i32
    return %arg0, %c0_i32 : i32, i32
  }
  func.func @transform_6(%arg0: i32, %arg1: memref<2xi32, #tpu.memory_space<smem>>) -> (i32, i32) {
    %c0_i32 = arith.constant 0 : i32
    %c0_i32_0 = arith.constant 0 : i32
    return %arg0, %c0_i32 : i32, i32
  }
}

</mosaic_0001>

<bundles_post_ra>
// kernel: tpu_custom_call.1
= control target key start
LH: loop header
LB: loop body
LE: loop exit
PB: predicated region body
PF: predicated region fallthrough
CT: control target
= control target key end

     0   :  { %s1205_s24 = smov [#allocation3]   ;;  %s1470_s0 = inlined_call_operand.hbm [shape: s32[2], index: 0, kind: input, shape index: {}]   ;;  %s1471_s1 = inlined_call_operand.hbm [shape: f32[48,128], index: 1, kind: input, shape index: {}]   ;;  %s1472_s2 = inlined_call_operand.hbm [shape: f32[384,128], index: 2, kind: input, shape index: {}]   ;;  %s1473_s3 = inlined_call_operand.vmem [shape: f32[1,128], index: 3, kind: input, shape index: {}]   ;;  %s1474_s4 = inlined_call_operand.hbm [shape: f32[384,128], index: 4, kind: input, shape index: {}]   ;;  %s1475_s5 = inlined_call_operand.vmem [shape: f32[1,128], index: 5, kind: input, shape index: {}]   ;;  %s1476_s6 = inlined_call_operand.hbm [shape: f32[32,128], index: 6, kind: output, shape index: {0}]   ;;  %s1477_s7 = inlined_call_operand.hbm [shape: f32[2,128], index: 7, kind: output, shape index: {1}]  }
   0x1   :  { %14 = dma.hbm_to_smem %s1470_s0, 16, %s1205_s24, [#allocation2] }
   0x2   :  { %1195 = dma.done.wait [#allocation2], 16 }
   0x3   :  { %1196 = vsyncadd [#allocation2], 4294967280 }
   0x4   :  { %16 = sfence }
   0x5   :  { %17 = vsyncpa [#allocation5], 0 }
   0x6   :  { %18 = vsyncpa [#allocation8], 0 }
   0x7   :  { %19 = vsyncpa [#allocation6], 0 }
   0x8   :  { %20 = vsyncpa [#allocation12], 0  ;;  %s1206_s27 = smov [#allocation7]   ;;  %s1207_s29 = smov [#allocation4]  }
   0x9   :  { %s38_s28 = sshll.u32 %s1206_s27, 4  ;;  %s26_s30 = sshll.u32 %s1207_s29, 4  ;;  %s39_s28 = int_to_ptr.vmem [resolvable:$true] %s38_s28  ;;  %s27_s30 = int_to_ptr.vmem [resolvable:$true] %s26_s30 }
   0xa   :  { %s1103_s8 = scalar_lea.vmem %s39_s28, 6144  ;;  %p1108_p1 = scmp.lt.s32.totalorder %s39_s28, %s39_s28 }
   0xb   :  { %p1104_p0 = scmp.ne.s32.totalorder %s39_s28, %s1103_s8  ;;  %p1109_p2 = scmp.lt.s32.totalorder %s1103_s8, %s1103_s8 }
   0xd   :  { %p1110_p3 = por %p1109_p2, %p1108_p1 }
   0xf   :  { %p1111_p4 = pnand %p1110_p3, %p1104_p0 }
  0x11   :  { %1114 = shalt.err (!%p1111_p4)
}
  0x12   :  { %s1208_s0 = smov 128   ;;  %s1209_s9 = smov 8  }
  0x13   :  { %44 = dma.hbm_to_vmem [thread:$0]  %s1472_s2, 6144, %s39_s28, [#allocation8], %s1208_s0, %s1208_s0, %s1209_s9  }
  0x14   :  { %s1123_s12 = scalar_lea.vmem %s27_s30, 768  ;;  %p1128_p6 = scmp.lt.s32.totalorder %s27_s30, %s27_s30 }
  0x15   :  { %p1124_p5 = scmp.ne.s32.totalorder %s27_s30, %s1123_s12  ;;  %p1129_p7 = scmp.lt.s32.totalorder %s1123_s12, %s1123_s12 }
  0x17   :  { %p1130_p8 = por %p1129_p7, %p1128_p6 }
  0x19   :  { %p1131_p9 = pnand %p1130_p8, %p1124_p5 }
  0x1b   :  { %1134 = shalt.err (!%p1131_p9)
}
  0x1c   :  { %32 = dma.hbm_to_vmem [thread:$0]  %s1471_s1, 768, %s27_s30, [#allocation5], %s1208_s0, %s1208_s0, %s1209_s9  }
  0x1d   :  { %s1210_s15 = smov [#allocation9]  }
  0x1e   :  { %s52_s16 = sshll.u32 %s1210_s15, 4  ;;  %s53_s16 = int_to_ptr.vmem [resolvable:$true] %s52_s16 }
  0x1f   :  { %s1143_s17 = scalar_lea.vmem %s53_s16, 6144  ;;  %p1148_p11 = scmp.lt.s32.totalorder %s53_s16, %s53_s16 }
  0x20   :  { %p1144_p10 = scmp.ne.s32.totalorder %s53_s16, %s1143_s17  ;;  %p1149_p12 = scmp.lt.s32.totalorder %s1143_s17, %s1143_s17 }
  0x22   :  { %p1150_p13 = por %p1149_p12, %p1148_p11 }
  0x24   :  { %p1151_p0 = pnand %p1150_p13, %p1144_p10 }
  0x26   :  { %1154 = shalt.err (!%p1151_p0)
}
  0x27   :  { %58 = dma.hbm_to_vmem [thread:$0]  %s1474_s4, 6144, %s53_s16, [#allocation8], %s1208_s0, %s1208_s0, %s1209_s9  }
  0x28   :  { %1197 = dma.done.wait [#allocation5], 768  }
  0x29   :  { %1198 = vsyncadd [#allocation5], 4294966528 }
  0x2a   :  { %1199 = dma.done.wait [#allocation8], 12288  }
  0x2b   :  { %1200 = vsyncadd [#allocation8], 4294955008  ;;  %v1211_v0 = vmov 0.0   ;;  %vm1212_vm0 = vmmov 0   ;;  %v137_v1 = vld [vmem:[#allocation7 + $0xf8] sm:$0xff]  ;;  %v136_v3 = vld [vmem:[#allocation7 + $0xf0] sm:$0xff] }
  0x2c   :  { %992 = vmatprep.subr.mxu1 %v1211_v0  ;;  %1024 = vmatprep.mubr.msk.f32.mxu1 %vm1212_vm0, %v1211_v0  ;;  %v121_v2 = vld [vmem:[#allocation7 + $0x78] sm:$0xff]  ;;  %v120_v4 = vld [vmem:[#allocation7 + $0x70] sm:$0xff]  ;;  %v135_v5 = vld [vmem:[#allocation7 + $0xe8] sm:$0xff]  ;;  %vm82_vm1 = vcmask 1046528   ;;  %vm94_vm2 = vcmask 1045504   ;;  %vm161_vm3 = vcmask 1044480  }
  0x2d   :  { %860 = vmatprep.subr.mxu0 %v137_v1  ;;  %v153_v6 = vld [vmem:[#allocation7 + $0x178] sm:$0xff]  ;;  %v119_v7 = vld [vmem:[#allocation7 + $0x68] sm:$0xff]  ;;  %v152_v8 = vld [vmem:[#allocation7 + $0x170] sm:$0xff]  ;;  %s1446_s22 = sld [smem:[#allocation3 + $0x1]]  ;;  %s1213_s23 = smov [#allocation10]  }
  0x2e   :  { %861 = vmatpush3.msra.mxu0 %v121_v2  ;;  %993 = vmatpush3.msra.mxu1 %v153_v6  ;;  %v134_v9 = vld [vmem:[#allocation7 + $0xe0] sm:$0xff]  ;;  %v151_v10 = vld [vmem:[#allocation7 + $0x168] sm:$0xff]  ;;  %v133_v12 = vld [vmem:[#allocation7 + $0xd8] sm:$0xff]  ;;  %s825_s24 = sshll.u32 %s1213_s23, 4  ;;  %s826_s24 = int_to_ptr.vmem [resolvable:$true] %s825_s24 }
  0x2f   :  { %862 = vmatprep.subr.mxu0 %v136_v3  ;;  %994 = vmatprep.subr.mxu1 %v1211_v0  ;;  %v118_v11 = vld [vmem:[#allocation7 + $0x60] sm:$0xff]  ;;  %v117_v14 = vld [vmem:[#allocation7 + $0x58] sm:$0xff]  ;;  %v132_v15 = vld [vmem:[#allocation7 + $0xd0] sm:$0xff]  ;;  %s1155_s25 = scalar_lea.vmem %s826_s24, 512  ;;  %p1160_p2 = scmp.lt.s32.totalorder %s826_s24, %s826_s24 }
  0x30   :  { %863 = vmatpush3.msra.mxu0 %v120_v4  ;;  %995 = vmatpush3.msra.mxu1 %v152_v8  ;;  %v150_v13 = vld [vmem:[#allocation7 + $0x160] sm:$0xff]  ;;  %v149_v16 = vld [vmem:[#allocation7 + $0x158] sm:$0xff]  ;;  %v116_v17 = vld [vmem:[#allocation7 + $0x50] sm:$0xff]  ;;  %p1156_p1 = scmp.ne.s32.totalorder %s826_s24, %s1155_s25  ;;  %p1161_p3 = scmp.lt.s32.totalorder %s1155_s25, %s1155_s25 }
  0x31   :  { %864 = vmatprep.subr.mxu0 %v135_v5  ;;  %996 = vmatprep.subr.mxu1 %v1211_v0  ;;  %v131_v18 = vld [vmem:[#allocation7 + $0xc8] sm:$0xff]  ;;  %v148_v19 = vld [vmem:[#allocation7 + $0x150] sm:$0xff]  ;;  %v130_v21 = vld [vmem:[#allocation7 + $0xc0] sm:$0xff] }
  0x32   :  { %865 = vmatpush3.msra.mxu0 %v119_v7  ;;  %997 = vmatpush3.msra.mxu1 %v151_v10  ;;  %v115_v20 = vld [vmem:[#allocation7 + $0x48] sm:$0xff]  ;;  %v114_v23 = vld [vmem:[#allocation7 + $0x40] sm:$0xff]  ;;  %v129_v24 = vld [vmem:[#allocation7 + $0xb8] sm:$0xff]  ;;  %p1162_p4 = por %p1161_p3, %p1160_p2 }
  0x33   :  { %866 = vmatprep.subr.mxu0 %v134_v9  ;;  %998 = vmatprep.subr.mxu1 %v1211_v0  ;;  %v147_v22 = vld [vmem:[#allocation7 + $0x148] sm:$0xff]  ;;  %v113_v25 = vld [vmem:[#allocation7 + $0x38] sm:$0xff]  ;;  %v146_v26 = vld [vmem:[#allocation7 + $0x140] sm:$0xff] }
  0x34   :  { %867 = vmatpush3.msra.mxu0 %v118_v11  ;;  %999 = vmatpush3.msra.mxu1 %v150_v13  ;;  %v1285_v27 = vld [vmem:[#allocation4] sm:$0xff]  ;;  %v1287_v28 = vld [vmem:[#allocation4 + $0x8] sm:$0xff]  ;;  %v1289_v29 = vld [vmem:[#allocation4 + $0x10] sm:$0xff]  ;;  %p1163_p5 = pnand %p1162_p4, %p1156_p1 }
  0x35   :  { %868 = vmatprep.subr.mxu0 %v133_v12  ;;  %1000 = vmatprep.subr.mxu1 %v1211_v0  ;;  %v128_v30 = vld [vmem:[#allocation7 + $0xb0] sm:$0xff]  ;;  %v145_v31 = vld [vmem:[#allocation7 + $0x138] sm:$0xff]  ;;  %v83_v32 = vrot.slane %v1285_v27, 1  ;;  %v84_v33 = vrot.slane %v1287_v28, 1  ;;  %v86_v34 = vrot.slane %v1289_v29, 1  ;;  %v1295_v36 = vld [vmem:[#allocation4 + $0x18] sm:$0xff] }
  0x36   :  { %869 = vmatpush3.msra.mxu0 %v117_v14  ;;  %1001 = vmatpush3.msra.mxu1 %v149_v16  ;;  %v112_v35 = vld [vmem:[#allocation7 + $0x30] sm:$0xff]  ;;  %v127_v37 = vld [vmem:[#allocation7 + $0xa8] sm:$0xff]  ;;  %v126_v42 = vld [vmem:[#allocation7 + $0xa0] sm:$0xff]  ;;  %v88_v44 = vrot.slane %v1295_v36, 1  ;;  %v95_v46 = vrot.slane %v1285_v27, 2  ;;  %v96_v47 = vrot.slane %v1287_v28, 2 }
  0x37   :  { %870 = vmatprep.subr.mxu0 %v132_v15  ;;  %1002 = vmatprep.subr.mxu1 %v1211_v0  ;;  %v144_v38 = vld [vmem:[#allocation7 + $0x130] sm:$0xff]  ;;  %v111_v39 = vld [vmem:[#allocation7 + $0x28] sm:$0xff]  ;;  %v85_v40 = vsel %vm82_vm1, %v83_v32, %v84_v33  ;;  %v1300_v41 = vsel %vm82_vm1, %v84_v33, %v86_v34  ;;  %v110_v45 = vld [vmem:[#allocation7 + $0x20] sm:$0xff]  ;;  %v98_v48 = vrot.slane %v1289_v29, 2  ;;  %v100_v62 = vrot.slane %v1295_v36, 2 }
  0x38   :  { %871 = vmatpush3.msra.mxu0 %v116_v17  ;;  %1003 = vmatpush3.msra.mxu1 %v148_v19  ;;  %v143_v43 = vld [vmem:[#allocation7 + $0x128] sm:$0xff]  ;;  %v1307_v49 = vld [vmem:[#allocation4 + $0x20] sm:$0xff]  ;;  %v125_v50 = vld [vmem:[#allocation7 + $0x98] sm:$0xff]  ;;  %v165_v52 = vrot.slane %v85_v40, 3  ;;  %v166_v53 = vrot.slane %v1300_v41, 3  ;;  %v89_v57 = vsel %vm82_vm1, %v86_v34, %v88_v44  ;;  %v97_v60 = vsel %vm94_vm2, %v95_v46, %v96_v47 }
  0x39   :  { %872 = vmatprep.subr.mxu0 %v131_v18  ;;  %1004 = vmatprep.subr.mxu1 %v1211_v0  ;;  %v142_v51 = vld [vmem:[#allocation7 + $0x120] sm:$0xff]  ;;  %v109_v54 = vld [vmem:[#allocation7 + $0x18] sm:$0xff]  ;;  %v124_v55 = vld [vmem:[#allocation7 + $0x90] sm:$0xff]  ;;  %v90_v58 = vrot.slane %v1307_v49, 1  ;;  %v99_v61 = vsel %vm94_vm2, %v96_v47, %v98_v48  ;;  %v162_v3 = vrot.slane %v1285_v27, 3  ;;  %v163_v4 = vrot.slane %v1287_v28, 3 }
  0x3a   :  { %873 = vmatpush3.msra.mxu0 %v115_v20  ;;  %1005 = vmatpush3.msra.mxu1 %v147_v22  ;;  %v141_v56 = vld [vmem:[#allocation7 + $0x118] sm:$0xff]  ;;  %v108_v59 = vld [vmem:[#allocation7 + $0x10] sm:$0xff]  ;;  %v123_v1 = vld [vmem:[#allocation7 + $0x88] sm:$0xff]  ;;  %v167_v2 = vsel %vm161_vm3, %v165_v52, %v166_v53  ;;  %v173_v7 = vrot.slane %v89_v57, 3  ;;  %v168_v9 = vrot.slane %v97_v60, 3  ;;  %v169_v10 = vrot.slane %v99_v61, 3 }
  0x3b   :  { %874 = vmatprep.subr.mxu0 %v130_v21  ;;  %1006 = vmatprep.subr.mxu1 %v1211_v0  ;;  %v1317_v63 = vld [vmem:[#allocation4 + $0x28] sm:$0xff]  ;;  %v107_v5 = vld [vmem:[#allocation7 + $0x8] sm:$0xff]  ;;  %v140_v6 = vld [vmem:[#allocation7 + $0x110] sm:$0xff]  ;;  %v91_v11 = vsel %vm82_vm1, %v88_v44, %v90_v58  ;;  %v101_v15 = vsel %vm94_vm2, %v98_v48, %v100_v62  ;;  %v102_v16 = vrot.slane %v1307_v49, 2  ;;  %v164_v17 = vsel %vm161_vm3, %v162_v3, %v163_v4 }
  0x3c   :  { %875 = vmatpush3.msra.mxu0 %v114_v23  ;;  %1007 = vmatpush3.msra.mxu1 %v146_v26  ;;  %v122_v8 = vld [vmem:[#allocation7 + $0x80] sm:$0xff]  ;;  %v92_v12 = vrot.slane %v1317_v63, 1  ;;  %v139_v14 = vld [vmem:[#allocation7 + $0x108] sm:$0xff]  ;;  %v171_v18 = vrot.slane %v1289_v29, 3  ;;  %v174_v19 = vsel %vm161_vm3, %v166_v53, %v173_v7  ;;  %v179_v21 = vrot.slane %v91_v11, 3  ;;  %v489_v28 = vld [vmem:[#allocation9 + $0x78] sm:$0xff] }
  0x3d   :  { %876 = vmatprep.subr.mxu0 %v129_v24  ;;  %1008 = vmatprep.subr.mxu1 %v1211_v0  ;;  %v106_v13 = vld [vmem:[#allocation7] sm:$0xff]  ;;  %v170_v22 = vsel %vm161_vm3, %v168_v9, %v169_v10  ;;  %v175_v23 = vrot.slane %v101_v15, 3  ;;  %v103_v26 = vsel %vm94_vm2, %v100_v62, %v102_v16  ;;  %v104_v27 = vrot.slane %v1317_v63, 2  ;;  %v488_v34 = vld [vmem:[#allocation9 + $0x70] sm:$0xff]  ;;  %v487_v53 = vld [vmem:[#allocation9 + $0x68] sm:$0xff] }
  0x3e   :  { %877 = vmatpush3.msra.mxu0 %v113_v25  ;;  %1009 = vmatpush3.msra.mxu1 %v145_v31  ;;  %v138_v20 = vld [vmem:[#allocation7 + $0x100] sm:$0xff]  ;;  %v93_v24 = vsel %vm82_vm1, %v90_v58, %v92_v12  ;;  %v505_v25 = vld [vmem:[#allocation9 + $0xf8] sm:$0xff]  ;;  %v172_v29 = vsel %vm161_vm3, %v163_v4, %v171_v18  ;;  %v504_v31 = vld [vmem:[#allocation9 + $0xf0] sm:$0xff]  ;;  %v180_v32 = vsel %vm161_vm3, %v173_v7, %v179_v21  ;;  %v183_v41 = vrot.slane %v1307_v49, 3 }
  0x3f   :  { %878 = vmatprep.subr.mxu0 %v128_v30  ;;  %1010 = vmatprep.subr.mxu1 %v1211_v0  ;;  %v177_v30 = vrot.slane %v1295_v36, 3  ;;  %v185_v33 = vrot.slane %v93_v24, 3  ;;  %v503_v36 = vld [vmem:[#allocation9 + $0xe8] sm:$0xff]  ;;  %v189_v47 = vrot.slane %v1317_v63, 3  ;;  %v501_v58 = vld [vmem:[#allocation9 + $0xd8] sm:$0xff]  ;;  %v500_v60 = vld [vmem:[#allocation9 + $0xd0] sm:$0xff] }
  0x40   :  { %879 = vmatpush3.msra.mxu0 %v112_v35  ;;  %1011 = vmatpush3.msra.mxu1 %v144_v38  ;;  %v176_v35 = vsel %vm161_vm3, %v169_v10, %v175_v23  ;;  %v521_v38 = vld [vmem:[#allocation9 + $0x178] sm:$0xff]  ;;  %v519_v57 = vld [vmem:[#allocation9 + $0x168] sm:$0xff]  ;;  %v484_v61 = vld [vmem:[#allocation9 + $0x50] sm:$0xff] }
  0x41   :  { %880 = vmatprep.subr.mxu0 %v127_v37  ;;  %1012 = vmatprep.subr.mxu1 %v1211_v0  ;;  %v181_v37 = vrot.slane %v103_v26, 3  ;;  %v178_v40 = vsel %vm161_vm3, %v171_v18, %v177_v30  ;;  %v184_v46 = vsel %vm161_vm3, %v177_v30, %v183_v41  ;;  %v517_v62 = vld [vmem:[#allocation9 + $0x158] sm:$0xff]  ;;  %v499_v63 = vld [vmem:[#allocation9 + $0xc8] sm:$0xff]  ;;  %v498_v3 = vld [vmem:[#allocation9 + $0xc0] sm:$0xff] }
  0x42   :  { %881 = vmatpush3.msra.mxu0 %v111_v39  ;;  %1013 = vmatpush3.msra.mxu1 %v143_v43  ;;  %v105_v39 = vsel %vm94_vm2, %v102_v16, %v104_v27  ;;  %v191_v43 = vrot.slane %v92_v12, 3  ;;  %v482_v4 = vld [vmem:[#allocation9 + $0x40] sm:$0xff]  ;;  %v481_v7 = vld [vmem:[#allocation9 + $0x38] sm:$0xff]  ;;  %v496_v9 = vld [vmem:[#allocation9 + $0xb0] sm:$0xff] }
  0x43   :  { %882 = vmatprep.subr.mxu0 %v126_v42  ;;  %1014 = vmatprep.subr.mxu1 %v1211_v0  ;;  %v186_v42 = vsel %vm161_vm3, %v179_v21, %v185_v33  ;;  %v182_v44 = vsel %vm161_vm3, %v175_v23, %v181_v37  ;;  %v480_v10 = vld [vmem:[#allocation9 + $0x30] sm:$0xff]  ;;  %v513_v11 = vld [vmem:[#allocation9 + $0x138] sm:$0xff]  ;;  %v495_v12 = vld [vmem:[#allocation9 + $0xa8] sm:$0xff] }
  0x44   :  { %883 = vmatpush3.msra.mxu0 %v110_v45  ;;  %1015 = vmatpush3.msra.mxu1 %v142_v51  ;;  %v187_v45 = vrot.slane %v105_v39, 3  ;;  %v192_v48 = vsel %vm161_vm3, %v185_v33, %v191_v43  ;;  %v190_v51 = vsel %vm161_vm3, %v183_v41, %v189_v47  ;;  %v494_v15 = vld [vmem:[#allocation9 + $0xa0] sm:$0xff]  ;;  %v493_v18 = vld [vmem:[#allocation9 + $0x98] sm:$0xff]  ;;  %v492_v21 = vld [vmem:[#allocation9 + $0x90] sm:$0xff] }
  0x45   :  { %884 = vmatprep.subr.mxu0 %v125_v50  ;;  %1016 = vmatprep.subr.mxu1 %v1211_v0  ;;  %v193_v50 = vrot.slane %v104_v27, 3  ;;  %v478_v16 = vld [vmem:[#allocation9 + $0x20] sm:$0xff]  ;;  %v509_v23 = vld [vmem:[#allocation9 + $0x118] sm:$0xff]  ;;  %v491_v24 = vld [vmem:[#allocation9 + $0x88] sm:$0xff] }
  0x46   :  { %885 = vmatpush3.msra.mxu0 %v109_v54  ;;  %1017 = vmatpush3.msra.mxu1 %v141_v56  ;;  %v188_v49 = vsel %vm161_vm3, %v181_v37, %v187_v45  ;;  %v520_v54 = vld [vmem:[#allocation9 + $0x170] sm:$0xff]  ;;  %v486_v56 = vld [vmem:[#allocation9 + $0x60] sm:$0xff] }
  0x47   :  { %886 = vmatprep.subr.mxu0 %v124_v55  ;;  %1018 = vmatprep.subr.mxu1 %v1211_v0  ;;  %v194_v52 = vsel %vm161_vm3, %v187_v45, %v193_v50  ;;  %v502_v55 = vld [vmem:[#allocation9 + $0xe0] sm:$0xff]  ;;  %v508_v26 = vld [vmem:[#allocation9 + $0x110] sm:$0xff] }
  0x48   :  { %887 = vmatpush3.msra.mxu0 %v108_v59  ;;  %274 = vmatprep.mubr.f32.mxu0 %v167_v2  ;;  %v485_v59 = vld [vmem:[#allocation9 + $0x58] sm:$0xff]  ;;  %v516_v2 = vld [vmem:[#allocation9 + $0x150] sm:$0xff]  ;;  %v490_v27 = vld [vmem:[#allocation9 + $0x80] sm:$0xff] }
  0x49   :  { %888 = vmatprep.subr.mxu0 %v123_v1  ;;  %1019 = vmatpush3.msra.mxu1 %v140_v6  ;;  %v483_v1 = vld [vmem:[#allocation9 + $0x48] sm:$0xff]  ;;  %v497_v6 = vld [vmem:[#allocation9 + $0xb8] sm:$0xff]  ;;  %v506_v30 = vld [vmem:[#allocation9 + $0x100] sm:$0xff] }
  0x4a   :  { %889 = vmatpush3.msra.mxu0 %v107_v5  ;;  %1020 = vmatprep.subr.mxu1 %v1211_v0  ;;  %v515_v5 = vld [vmem:[#allocation9 + $0x148] sm:$0xff] }
  0x4b   :  { %890 = vmatprep.subr.mxu0 %v122_v8  ;;  %1021 = vmatpush3.msra.mxu1 %v139_v14  ;;  %v514_v8 = vld [vmem:[#allocation9 + $0x140] sm:$0xff]  ;;  %v512_v14 = vld [vmem:[#allocation9 + $0x130] sm:$0xff] }
  0x4c   :  { %891 = vmatpush3.msra.mxu0 %v106_v13  ;;  %1022 = vmatprep.subr.mxu1 %v1211_v0  ;;  %v479_v13 = vld [vmem:[#allocation9 + $0x28] sm:$0xff] }
  0x4d   :  { %275 = vmatmul.mubr.f32.vlgmr.msra.gmra.mxu0 %v164_v17  ;;  %1023 = vmatpush3.msra.mxu1 %v138_v20  ;;  %v511_v17 = vld [vmem:[#allocation9 + $0x128] sm:$0xff]  ;;  %v510_v20 = vld [vmem:[#allocation9 + $0x120] sm:$0xff] }
  0x4e   :  { %279 = vmatprep.mubr.f32.mxu0 %v174_v19  ;;  %1025 = vmatmul.mubr.f32.vlgmr.msra.gmra.mxu1 %v170_v22  ;;  %v477_v19 = vld [vmem:[#allocation9 + $0x18] sm:$0xff]  ;;  %v476_v22 = vld [vmem:[#allocation9 + $0x10] sm:$0xff] }
  0x4f   :  { %928 = vmatprep.subr.mxu0 %v505_v25  ;;  %1027 = vmatprep.mubr.msk.f32.mxu1 %vm1212_vm0, %v1211_v0  ;;  %v475_v25 = vld [vmem:[#allocation9 + $0x8] sm:$0xff] }
  0x50   :  { %929 = vmatpush3.msra.mxu0 %v489_v28  ;;  %1039 = vmatprep.subr.mxu1 %v521_v38  ;;  %v474_v28 = vld [vmem:[#allocation9] sm:$0xff] }
  0x51   :  { %280 = vmatmul.mubr.f32.gmra.mxu0 %v172_v29  ;;  %930 = vmatprep.subr.mxu0 %v504_v31  ;;  %v507_v29 = vld [vmem:[#allocation9 + $0x108] sm:$0xff]  ;;  %v395_v31 = vlaneseq }
  0x52   :  { %284 = vmatprep.mubr.f32.mxu0 %v180_v32  ;;  %931 = vmatpush3.msra.mxu0 %v488_v34 }
  0x53   :  { %1028 = vmatmul.mubr.f32.gmra.mxu1 %v176_v35  ;;  %932 = vmatprep.subr.mxu0 %v503_v36  ;;  %v1360_v32 = vshrl.u32 %v395_v31, 7  ;;  %v1372_v36 = vld [vmem:[%s1473_s3] ss:$0 sm:$0xff]  ;;  %s783_s3 = sld [smem:[#allocation3]] }
  0x54   :  { %1030 = vmatprep.mubr.msk.f32.mxu1 %vm1212_vm0, %v1211_v0  ;;  %1040 = vmatpush3.msra.mxu1 %v521_v38 }
  0x55   :  { %285 = vmatmul.mubr.f32.gmra.mxu0 %v178_v40  ;;  %1041 = vmatprep.subr.mxu1 %v520_v54  ;;  %v853_v33 = vadd.s32 4294967292, %v1360_v32  ;;  %v1364_v37 = vadd.s32 8, %v1360_v32  ;;  %v1367_v38 = vadd.s32 16, %v1360_v32 }
  0x56   :  { %289 = vmatprep.mubr.f32.mxu0 %v186_v42  ;;  %933 = vmatpush3.msra.mxu0 %v487_v53 }
  0x57   :  { %1031 = vmatmul.mubr.f32.gmra.mxu1 %v182_v44  ;;  %934 = vmatprep.subr.mxu0 %v502_v55  ;;  %v406_v35 = vand.u32 15, %v853_v33  ;;  %vm411_vm4 = vcmp.ge.s32.totalorder %v853_v33, 0  ;;  %v854_v44 = vadd.s32 4294967292, %v1364_v37  ;;  %v855_v45 = vadd.s32 4294967292, %v1367_v38 }
  0x58   :  { %1033 = vmatprep.mubr.msk.f32.mxu1 %vm1212_vm0, %v1211_v0  ;;  %1042 = vmatpush3.msra.mxu1 %v520_v54 }
  0x59   :  { %290 = vmatmul.mubr.f32.gmra.mxu0 %v184_v46  ;;  %1043 = vmatprep.subr.mxu1 %v519_v57  ;;  %vm426_vm5 = vcmp.ge.s32.totalorder %v406_v35, 1  ;;  %vm1382_vm7 = vcmp.lt.s32.totalorder %v406_v35, 9  ;;  %v407_v55 = vand.u32 15, %v854_v44  ;;  %s786_s21 = sadd.s32 1, %s783_s3 }
  0x5a   :  { %294 = vmatprep.mubr.f32.mxu0 %v192_v48  ;;  %935 = vmatpush3.msra.mxu0 %v486_v56  ;;  %vm1378_vm6 = vmand %vm411_vm4, %vm426_vm5 }
  0x5b   :  { %1034 = vmatmul.mubr.f32.gmra.mxu1 %v188_v49  ;;  %936 = vmatprep.subr.mxu0 %v501_v58  ;;  %v400_v49 = vadd.s32 32, %v1360_v32  ;;  %v1387_v58 = vadd.s32 24, %v1360_v32  ;;  %vm441_vm8 = vmand %vm1378_vm6, %vm1382_vm7  ;;  %vm437_vm9 = vcmp.lt.s32.totalorder %v407_v55, 9 }
  0x5c   :  { %1036 = vmatprep.mubr.msk.f32.mxu1 %vm1212_vm0, %v1211_v0  ;;  %1044 = vmatpush3.msra.mxu1 %v519_v57  ;;  %v518_v0 = vld [vmem:[#allocation9 + $0x160] sm:$0xff]  ;;  %v408_v57 = vand.u32 15, %v855_v45 }
  0x5d   :  { %295 = vmatmul.mubr.f32.gmra.mxu0 %v190_v51  ;;  %1045 = vmatprep.subr.mxu1 %v518_v0 }
  0x5e   :  { %937 = vmatpush3.msra.mxu0 %v485_v59  ;;  %1046 = vmatpush3.msra.mxu1 %v518_v0  ;;  %vm1394_vm10 = vcmp.ge.s32.totalorder %v408_v57, 1  ;;  %vm1400_vm11 = vcmp.lt.s32.totalorder %v408_v57, 9 }
  0x5f   :  { %1037 = vmatmul.mubr.f32.gmra.mxu1 %v194_v52  ;;  %938 = vmatprep.subr.mxu0 %v500_v60  ;;  %vm443_vm12 = vmand %vm1394_vm10, %vm1400_vm11 }
  0x60   :  { %939 = vmatpush3.msra.mxu0 %v484_v61  ;;  %1047 = vmatprep.subr.mxu1 %v517_v62 }
  0x61   :  { %940 = vmatprep.subr.mxu0 %v499_v63  ;;  %1048 = vmatpush3.msra.mxu1 %v517_v62  ;;  %v857_v62 = vadd.s32 4294967292, %v400_v49 }
  0x62   :  { %941 = vmatpush3.msra.mxu0 %v483_v1  ;;  %1049 = vmatprep.subr.mxu1 %v516_v2 }
  0x63   :  { %942 = vmatprep.subr.mxu0 %v498_v3  ;;  %1050 = vmatpush3.msra.mxu1 %v516_v2  ;;  %vm420_vm13 = vcmp.lt.s32.totalorder %v857_v62, 32 }
  0x64   :  { %943 = vmatpush3.msra.mxu0 %v482_v4  ;;  %1051 = vmatprep.subr.mxu1 %v515_v5 }
  0x65   :  { %944 = vmatprep.subr.mxu0 %v497_v6  ;;  %1052 = vmatpush3.msra.mxu1 %v515_v5  ;;  %v856_v5 = vadd.s32 4294967292, %v1387_v58 }
  0x66   :  { %945 = vmatpush3.msra.mxu0 %v481_v7  ;;  %1053 = vmatprep.subr.mxu1 %v514_v8 }
  0x67   :  { %946 = vmatprep.subr.mxu0 %v496_v9  ;;  %1054 = vmatpush3.msra.mxu1 %v514_v8 }
  0x68   :  { %947 = vmatpush3.msra.mxu0 %v480_v10  ;;  %1055 = vmatprep.subr.mxu1 %v513_v11 }
  0x69   :  { %948 = vmatprep.subr.mxu0 %v495_v12  ;;  %1056 = vmatpush3.msra.mxu1 %v513_v11  ;;  %v410_v12 = vand.u32 15, %v857_v62 }
  0x6a   :  { %949 = vmatpush3.msra.mxu0 %v479_v13  ;;  %1057 = vmatprep.subr.mxu1 %v512_v14 }
  0x6b   :  { %950 = vmatprep.subr.mxu0 %v494_v15  ;;  %1058 = vmatpush3.msra.mxu1 %v512_v14  ;;  %vm430_vm14 = vcmp.ge.s32.totalorder %v410_v12, 1  ;;  %vm1416_vm4 = vcmp.lt.s32.totalorder %v410_v12, 9 }
  0x6c   :  { %951 = vmatpush3.msra.mxu0 %v478_v16  ;;  %1059 = vmatprep.subr.mxu1 %v511_v17  ;;  %vm1412_vm0 = vmand %vm420_vm13, %vm430_vm14 }
  0x6d   :  { %952 = vmatprep.subr.mxu0 %v493_v18  ;;  %1060 = vmatpush3.msra.mxu1 %v511_v17  ;;  %vm445_vm5 = vmand %vm1412_vm0, %vm1416_vm4 }
  0x6e   :  { %953 = vmatpush3.msra.mxu0 %v477_v19  ;;  %1061 = vmatprep.subr.mxu1 %v510_v20 }
  0x6f   :  { %954 = vmatprep.subr.mxu0 %v492_v21  ;;  %1062 = vmatpush3.msra.mxu1 %v510_v20  ;;  %v409_v20 = vand.u32 15, %v856_v5 }
  0x70   :  { %955 = vmatpush3.msra.mxu0 %v476_v22  ;;  %1063 = vmatprep.subr.mxu1 %v509_v23 }
  0x71   :  { %956 = vmatprep.subr.mxu0 %v491_v24  ;;  %1064 = vmatpush3.msra.mxu1 %v509_v23  ;;  %vm439_vm15 = vcmp.lt.s32.totalorder %v409_v20, 9 }
  0x72   :  { %957 = vmatpush3.msra.mxu0 %v475_v25  ;;  %1065 = vmatprep.subr.mxu1 %v508_v26 }
  0x73   :  { %958 = vmatprep.subr.mxu0 %v490_v27  ;;  %1066 = vmatpush3.msra.mxu1 %v508_v26 }
  0x74   :  { %959 = vmatpush3.msra.mxu0 %v474_v28  ;;  %1067 = vmatprep.subr.mxu1 %v507_v29 }
  0x75   :  { %1068 = vmatpush3.msra.mxu1 %v507_v29 }
  0x76   :  { %1069 = vmatprep.subr.mxu1 %v506_v30 }
  0x77   :  { %1070 = vmatpush3.msra.mxu1 %v506_v30 }
 0x10d   :  { %v892_v34 = vpop.f32.mrf.mxu0 }
 0x10e   :  { %v366_v40 = vpop.f32.mrf.mxu1 }
 0x10f   :  { %v893_v39 = vpop.f32.mrf.mxu0 }
 0x110   :  { %v894_v41 = vadd.f32 %v893_v39, %v892_v34  ;;  %v1026_v43 = vpop.f32.mrf.mxu1 }
 0x111   :  { %v895_v42 = vpop.f32.mrf.mxu0 }
 0x112   :  { %v277_v46 = vadd.f32 %v894_v41, %v1372_v36 }
 0x113   :  { %v896_v47 = vpop.f32.mrf.mxu0  ;;  %v371_v48 = vpop.f32.mrf.mxu1 }
 0x114   :  { %v367_v50 = vadd.f32 %v366_v40, %v277_v46  ;;  %v897_v53 = vadd.f32 %v896_v47, %v895_v42 }
 0x115   :  { %v898_v54 = vpop.f32.mrf.mxu0  ;;  %v1029_v56 = vpop.f32.mrf.mxu1 }
 0x116   :  { %v390_v59 = vmax.f32 %v367_v50, 0.0  ;;  %v282_v0 = vadd.f32 %v897_v53, %v1372_v36 }
 0x117   :  { %v899_v60 = vpop.f32.mrf.mxu0  ;;  %v376_v61 = vpop.f32.mrf.mxu1 }
 0x118   :  { %v372_v63 = vadd.f32 %v371_v48, %v282_v0  ;;  %v900_v1 = vadd.f32 %v899_v60, %v898_v54  ;;  %v446_v6 = vsel %vm441_vm8, %v390_v59, 0.0 }
 0x119   :  { %v901_v2 = vpop.f32.mrf.mxu0  ;;  %v1032_v4 = vpop.f32.mrf.mxu1  ;;  %v456_v16 = vrot.slane %v446_v6, 1  ;;  %v465_v22 = vrot.slane %v446_v6, 2  ;;  %v529_v52 = vrot.slane %v446_v6, 3 }
 0x11a   :  { %v391_v7 = vmax.f32 %v372_v63, 0.0  ;;  %v287_v8 = vadd.f32 %v900_v1, %v1372_v36 }
 0x11b   :  { %v902_v10 = vpop.f32.mrf.mxu0  ;;  %v381_v11 = vpop.f32.mrf.mxu1 }
 0x11c   :  { %v447_v13 = vsel %vm437_vm9, %v391_v7, 0.0  ;;  %v377_v14 = vadd.f32 %v376_v61, %v287_v8  ;;  %v903_v15 = vadd.f32 %v902_v10, %v901_v2 }
 0x11d   :  { %v457_v17 = vrot.slane %v447_v13, 1  ;;  %v466_v18 = vrot.slane %v447_v13, 2  ;;  %v904_v19 = vpop.f32.mrf.mxu0  ;;  %v1035_v21 = vpop.f32.mrf.mxu1  ;;  %v530_v39 = vrot.slane %v447_v13, 3 }
 0x11e   :  { %v392_v23 = vmax.f32 %v377_v14, 0.0  ;;  %v292_v24 = vadd.f32 %v903_v15, %v1372_v36 }
 0x11f   :  { %v905_v25 = vpop.f32.mrf.mxu0  ;;  %v386_v26 = vpop.f32.mrf.mxu1  ;;  %v458_v27 = vsel %vm82_vm1, %v456_v16, %v457_v17  ;;  %v467_v31 = vsel %vm94_vm2, %v465_v22, %v466_v18  ;;  %v531_v0 = vsel %vm161_vm3, %v529_v52, %v530_v39  ;;  %v858_v22 = vld [vmem:[%s1475_s5] ss:$0 sm:$0xff]  ;;  %s804_s5 = sadd.s32 1, %s1446_s22 }
 0x120   :  { %v448_v28 = vsel %vm443_vm12, %v392_v23, 0.0  ;;  %v382_v29 = vadd.f32 %v381_v11, %v292_v24  ;;  %v906_v30 = vadd.f32 %v905_v25, %v904_v19  ;;  %v532_v45 = vrot.slane %v458_v27, 3 }
 0x121   :  { %v459_v33 = vrot.slane %v448_v28, 1  ;;  %v468_v34 = vrot.slane %v448_v28, 2  ;;  %v1038_v35 = vpop.f32.mrf.mxu1  ;;  %v535_v47 = vrot.slane %v467_v31, 3  ;;  %v538_v54 = vrot.slane %v448_v28, 3 }
 0x122   :  { %v393_v40 = vmax.f32 %v382_v29, 0.0  ;;  %v297_v41 = vadd.f32 %v906_v30, %v1372_v36  ;;  %v787_v31 = vstv %s786_s21 }
 0x123   :  { %v460_v44 = vsel %vm82_vm1, %v457_v17, %v459_v33  ;;  %v469_v46 = vsel %vm94_vm2, %v466_v18, %v468_v34  ;;  %v539_v5 = vsel %vm161_vm3, %v530_v39, %v538_v54  ;;  %vm789_vm7 = vcmp.lt.s32.totalorder %v1364_v37, %v787_v31 }
 0x124   :  { %v449_v48 = vsel %vm439_vm15, %v393_v40, 0.0  ;;  %v387_v49 = vadd.f32 %v386_v26, %v297_v41  ;;  %v533_v50 = vrot.slane %v460_v44, 3  ;;  %v536_v51 = vrot.slane %v469_v46, 3 }
 0x125   :  { %v461_v36 = vrot.slane %v449_v48, 1  ;;  %v470_v53 = vrot.slane %v449_v48, 2  ;;  %v544_v6 = vrot.slane %v449_v48, 3  ;;  %v742_v26 = vand.u32 15, %v1360_v32 }
 0x126   :  { %v394_v55 = vmax.f32 %v387_v49, 0.0  ;;  %v534_v56 = vsel %vm161_vm3, %v532_v45, %v533_v50  ;;  %v537_v57 = vsel %vm161_vm3, %v535_v47, %v536_v51  ;;  %v744_v46 = vand.u32 15, %v1367_v38 }
 0x127   :  { %v471_v59 = vsel %vm94_vm2, %v468_v34, %v470_v53  ;;  %632 = vmatprep.mubr.f32.mxu0 %v534_v56  ;;  %1071 = vmatprep.mubr.f32.mxu1 %v537_v57  ;;  %v462_v60 = vsel %vm82_vm1, %v459_v33, %v461_v36  ;;  %v545_v17 = vsel %vm161_vm3, %v538_v54, %v544_v6  ;;  %v743_v34 = vand.u32 15, %v1364_v37 }
 0x128   :  { %v542_v61 = vrot.slane %v471_v59, 3  ;;  %v450_v62 = vsel %vm445_vm5, %v394_v55, 0.0  ;;  %633 = vmatmul.mubr.f32.vlgmr.msra.gmra.mxu0 %v531_v0  ;;  %v540_v63 = vrot.slane %v462_v60, 3  ;;  %vm760_vm9 = vcmp.ge.s32.totalorder %v744_v46, 1 }
 0x129   :  { %v463_v1 = vrot.slane %v450_v62, 1  ;;  %v472_v2 = vrot.slane %v450_v62, 2  ;;  %v550_v16 = vrot.slane %v450_v62, 3  ;;  %vm767_vm6 = vcmp.lt.s32.totalorder %v743_v34, 9 }
 0x12a   :  { %v541_v3 = vsel %vm161_vm3, %v533_v50, %v540_v63  ;;  %v543_v4 = vsel %vm161_vm3, %v536_v51, %v542_v61  ;;  %v745_v38 = vand.u32 15, %v1387_v58 }
 0x12b   :  { %637 = vmatprep.mubr.f32.mxu0 %v541_v3  ;;  %1072 = vmatmul.mubr.f32.vlgmr.msra.gmra.mxu1 %v543_v4  ;;  %v464_v7 = vsel %vm82_vm1, %v461_v36, %v463_v1  ;;  %v473_v8 = vsel %vm94_vm2, %v470_v53, %v472_v2  ;;  %v554_v9 = vrot.slane %v472_v2, 3  ;;  %v552_v12 = vrot.slane %v463_v1, 3 }
 0x12c   :  { %638 = vmatmul.mubr.f32.gmra.mxu0 %v539_v5  ;;  %v546_v10 = vrot.slane %v464_v7, 3  ;;  %v548_v11 = vrot.slane %v473_v8, 3  ;;  %v551_v19 = vsel %vm161_vm3, %v544_v6, %v550_v16  ;;  %vm758_vm1 = vcmp.ge.s32.totalorder %v742_v26, 1 }
 0x12d   :  { %vm784_vm2 = vcmp.ge.s32.totalorder %v1360_v32, 1  ;;  %v805_v53 = vstv %s804_s5  ;;  %vm769_vm11 = vcmp.lt.s32.totalorder %v745_v38, 9 }
 0x12e   :  { %v547_v13 = vsel %vm161_vm3, %v540_v63, %v546_v10  ;;  %v549_v14 = vsel %vm161_vm3, %v542_v61, %v548_v11  ;;  %v555_v15 = vsel %vm161_vm3, %v548_v11, %v554_v9  ;;  %v553_v18 = vsel %vm161_vm3, %v546_v10, %v552_v12 }
 0x12f   :  { %642 = vmatprep.mubr.f32.mxu0 %v547_v13  ;;  %1074 = vmatprep.mubr.f32.mxu1 %v549_v14  ;;  %vm788_vm3 = vcmp.lt.s32.totalorder %v1360_v32, %v787_v31  ;;  %vm806_vm10 = vcmp.lt.s32.totalorder %v1360_v32, %v805_v53  ;;  %vm807_vm12 = vcmp.lt.s32.totalorder %v1364_v37, %v805_v53 }
 0x130   :  { %643 = vmatmul.mubr.f32.gmra.mxu0 %v545_v17  ;;  %1075 = vmatmul.mubr.f32.gmra.mxu1 %v555_v15  ;;  %vm790_vm8 = vmand %vm784_vm2, %vm788_vm3 }
 0x131   :  { %647 = vmatprep.mubr.f32.mxu0 %v553_v18  ;;  %vm808_vm13 = vmand %vm784_vm2, %vm806_vm10 }
 0x134   :  { %648 = vmatmul.mubr.f32.gmra.mxu0 %v551_v19 }
 0x1e8   :  { %v960_v20 = vpop.f32.mrf.mxu0 }
 0x1ea   :  { %v961_v21 = vpop.f32.mrf.mxu0 }
 0x1eb   :  { %v962_v23 = vadd.f32 %v961_v21, %v960_v20  ;;  %v1073_v24 = vpop.f32.mrf.mxu1 }
 0x1ec   :  { %v963_v25 = vpop.f32.mrf.mxu0 }
 0x1ed   :  { %v635_v27 = vadd.f32 %v962_v23, %v858_v22  ;;  %v719_v28 = vpop.f32.mrf.mxu1 }
 0x1ee   :  { %v964_v29 = vpop.f32.mrf.mxu0 }
 0x1ef   :  { %v720_v30 = vadd.f32 %v719_v28, %v635_v27  ;;  %v965_v33 = vadd.f32 %v964_v29, %v963_v25 }
 0x1f0   :  { %v966_v35 = vpop.f32.mrf.mxu0  ;;  %v1076_v41 = vpop.f32.mrf.mxu1 }
 0x1f1   :  { %v738_v39 = vmax.f32 %v720_v30, 0.0  ;;  %v640_v40 = vadd.f32 %v965_v33, %v858_v22 }
 0x1f2   :  { %v967_v42 = vpop.f32.mrf.mxu0  ;;  %v729_v50 = vpop.f32.mrf.mxu1 }
 0x1f3   :  { %v774_v43 = vsel %vm758_vm1, %v738_v39, 0.0  ;;  %v725_v44 = vadd.f32 %v1073_v24, %v640_v40  ;;  %v968_v45 = vadd.f32 %v967_v42, %v966_v35 }
 0x1f4   :  { %778 = vst [vmem:[#allocation10] sm:$0xff] %v774_v43  ;;  %v969_v47 = vpop.f32.mrf.mxu0  ;;  %v792_v55 = vsel %vm790_vm8, %v774_v43, -inf }
 0x1f5   :  { %v739_v48 = vmax.f32 %v725_v44, 0.0  ;;  %v645_v49 = vadd.f32 %v968_v45, %v858_v22 }
 0x1f6   :  { %v970_v51 = vpop.f32.mrf.mxu0 }
 0x1f7   :  { %v775_v52 = vsel %vm767_vm6, %v739_v48, 0.0  ;;  %v730_v36 = vadd.f32 %v729_v50, %v645_v49  ;;  %v971_v54 = vadd.f32 %v970_v51, %v969_v47 }
 0x1f8   :  { %779 = vst [vmem:[#allocation10 + $0x8] sm:$0xff] %v775_v52  ;;  %v793_v56 = vsel %vm789_vm7, %v775_v52, -inf }
 0x1f9   :  { %v794_v57 = vmax.f32 %v792_v55, %v793_v56  ;;  %v740_v59 = vmax.f32 %v730_v36, 0.0  ;;  %v650_v0 = vadd.f32 %v971_v54, %v858_v22 }
 0x1fb   :  { %v795_v60 = vrot.slane %v794_v57, 4  ;;  %v776_v61 = vsel %vm760_vm9, %v740_v59, 0.0  ;;  %v735_v62 = vadd.f32 %v1076_v41, %v650_v0 }
 0x1fc   :  { %780 = vst [vmem:[#allocation10 + $0x10] sm:$0xff] %v776_v61  ;;  %v810_v3 = vsel %vm808_vm13, %v776_v61, -inf }
 0x1fd   :  { %v741_v63 = vmax.f32 %v735_v62, 0.0  ;;  %v796_v1 = vmax.f32 %v794_v57, %v795_v60 }
 0x1ff   :  { %v777_v58 = vsel %vm769_vm11, %v741_v63, 0.0  ;;  %v797_v2 = vrot.slane %v796_v1, 2 }
 0x200   :  { %781 = vst [vmem:[#allocation10 + $0x18] sm:$0xff] %v777_v58  ;;  %v811_v4 = vsel %vm807_vm12, %v777_v58, -inf }
 0x201   :  { %v812_v5 = vmax.f32 %v810_v3, %v811_v4 }
 0x202   :  { %1166 = shalt.err (!%p1163_p5)
}
 0x203   :  { %831 = dma.vmem_to_hbm [thread:$0]  %s826_s24, 512, %s1476_s6, [#allocation6], %s1208_s0, %s1208_s0, %s1209_s9   ;;  %v798_v32 = vmax.f32 %v796_v1, %v797_v2  ;;  %v813_v37 = vrot.slane %v812_v5, 4 }
 0x204   :  { %s1214_s28 = smov [#allocation11]  }
 0x205   :  { %v799_v6 = vrot.slane %v798_v32, 1  ;;  %v814_v8 = vmax.f32 %v812_v5, %v813_v37  ;;  %s838_s29 = sshll.u32 %s1214_s28, 4  ;;  %s839_s29 = int_to_ptr.vmem [resolvable:$true] %s838_s29 }
 0x206   :  { %s1175_s30 = scalar_lea.vmem %s839_s29, 32  ;;  %p1180_p7 = scmp.lt.s32.totalorder %s839_s29, %s839_s29 }
 0x207   :  { %v800_v7 = vmax.f32 %v798_v32, %v799_v6  ;;  %v815_v9 = vrot.slane %v814_v8, 2  ;;  %p1176_p6 = scmp.ne.s32.totalorder %s839_s29, %s1175_s30  ;;  %p1181_p8 = scmp.lt.s32.totalorder %s1175_s30, %s1175_s30 }
 0x209   :  { %801 = vst [vmem:[#allocation11] sm:$0x1] %v800_v7  ;;  %v816_v10 = vmax.f32 %v814_v8, %v815_v9  ;;  %p1182_p9 = por %p1181_p8, %p1180_p7 }
 0x20b   :  { %v817_v11 = vrot.slane %v816_v10, 1  ;;  %p1183_p10 = pnand %p1182_p9, %p1176_p6 }
 0x20d   :  { %v818_v12 = vmax.f32 %v816_v10, %v817_v11 }
 0x20f   :  { %819 = vst [vmem:[#allocation11 + $0x1] sm:$0x1] %v818_v12 }
 0x210   :  { %1186 = shalt.err (!%p1183_p10)
}
 0x211   :  { %841 = dma.vmem_to_hbm [thread:$0]  %s839_s29, 32, %s1477_s7, [#allocation12]  }
 0x212   :  { %1201 = dma.done.wait [#allocation6], 512  }
 0x213   :  { %1202 = vsyncadd [#allocation6], 4294966784 }
 0x214   :  { %1203 = dma.done.wait [#allocation12], 32  }
 0x215   :  { %1204 = vsyncadd [#allocation12], 4294967264 }
 0x216   :  { %848 = vsyncpa [#allocation5], 1 }
 0x217   :  { %849 = vsyncpa [#allocation8], 1 }
 0x218   :  { %850 = vsyncpa [#allocation6], 1 }
 0x219   :  { %851 = vsyncpa [#allocation12], 1 }

</bundles_post_ra>
